<compile_context>
chip_gen: v7x
topology: tpu7x:2x2x1
jax: 0.10.0
libtpu: 0.0.40
codegen_flags: <defaults>
</compile_context>

<pallas_src>
import jax
import jax.numpy as jnp
from jax.experimental import pallas as pl
from jax.experimental.pallas import tpu as pltpu

_LANE = 128      # vreg lane width
_SUBLANE = 8     # vreg sublane width — batch-tile granularity


def _round_up(x, m):
    return ((x + m - 1) // m) * m


def _pad_feature(n):
    # Lane-dense padding only when it helps: dims <= 128 are legal as
    # full-dim blocks and padding them only wastes MXU columns / HBM stores.
    return _round_up(n, _LANE) if n > _LANE else n


def _num_tensorcores():
    # v7x has 2 TensorCores per chip; v5e/v6e have 1.
    try:
        kind = jax.devices()[0].device_kind.lower()
        return 2 if "v7" in kind else 1
    except Exception:
        return 1


def _default_vmem_budget():
    try:
        kind = jax.devices()[0].device_kind.lower()
    except Exception:
        kind = ""
    # v7x: 64 MiB physical VMEM per TC -> leave headroom.  v5e/v6e: 128 MiB.
    return (40 << 20) if "v7" in kind else (64 << 20)


# ----------------------------------------------------------------------------
# Kernels
# ----------------------------------------------------------------------------
def _mlp_kernel(x_ref, w1_ref, b1_ref, w2_ref, b2_ref, o_ref):
    # Linear 1 on the MXU, f32 accumulation.
    h = jnp.dot(x_ref[...], w1_ref[...], preferred_element_type=jnp.float32)
    # Bias + LeakyReLU(0.2) in f32 on the VPU (v5e has no bf16 VPU).
    h = h + b1_ref[...]
    h = jnp.where(h > 0, h, 0.2 * h)
    # Linear 2 on the MXU (activations cast to the weight/MXU input dtype).
    y = jnp.dot(h.astype(w2_ref.dtype), w2_ref[...],
                preferred_element_type=jnp.float32)
    o_ref[...] = (y + b2_ref[...]).astype(o_ref.dtype)


def _mlp_kernel_ktiled(x_ref, w1_ref, b1_ref, w2_ref, b2_ref, o_ref, acc_ref):
    # Reduction over D (grid axis 1, "arbitrary", last).  P3 accumulator.
    k = pl.program_id(1)

    @pl.when(k == 0)
    def _():
        acc_ref[...] = jnp.zeros_like(acc_ref)

    acc_ref[...] += jnp.dot(x_ref[...], w1_ref[...],
                            preferred_element_type=jnp.float32)

    @pl.when(k == pl.num_programs(1) - 1)
    def _():
        h = acc_ref[...] + b1_ref[...]
        h = jnp.where(h > 0, h, 0.2 * h)
        y = jnp.dot(h.astype(w2_ref.dtype), w2_ref[...],
                    preferred_element_type=jnp.float32)
        o_ref[...] = (y + b2_ref[...]).astype(o_ref.dtype)


# ----------------------------------------------------------------------------
# One-time parameter preparation (hoisted out of the forward call)
# ----------------------------------------------------------------------------
def prepare_mlp_params(w1, b1, w2, b2, *, compute_dtype=jnp.bfloat16):
    """Pad/cast the MLP parameters once; reuse the result across forward calls.

    w1: [D, H], b1: [H] or [1, H], w2: [H, O], b2: [O] or [1, O]
    (weights are stored transposed vs. PyTorch's [out, in]: forward is x@W+b).
    """
    D, H = w1.shape
    O = w2.shape[1]
    Hp, Op = _pad_feature(H), _pad_feature(O)
    cdt = jnp.dtype(compute_dtype)

    w1p = w1.astype(cdt)
    w2p = w2.astype(cdt)
    if Hp != H:
        w1p = jnp.zeros((D, Hp), cdt).at[:, :H].set(w1p)
        w2p = jnp.zeros((Hp, O), cdt).at[:H, :].set(w2p)
    if Op != O:
        w2p = jnp.zeros((w2p.shape[0], Op), cdt).at[:, :O].set(w2p)

    # Biases stay f32: bias add / LeakyReLU are done in f32 inside the kernel.
    b1p = b1.reshape(1, -1).astype(jnp.float32)
    b2p = b2.reshape(1, -1).astype(jnp.float32)
    if Hp != H:
        b1p = jnp.zeros((1, Hp), jnp.float32).at[:, :H].set(b1p)
    if Op != O:
        b2p = jnp.zeros((1, Op), jnp.float32).at[:, :O].set(b2p)

    return dict(w1=w1p, b1=b1p, w2=w2p, b2=b2p,
                D=D, H=H, O=O, Hp=Hp, Op=Op, compute_dtype=cdt)


# ----------------------------------------------------------------------------
# Tile selection
# ----------------------------------------------------------------------------
def _pick_block_b(B, D, Hp, Op, x_bytes, w_bytes, out_bytes, budget_bytes,
                  num_cores):
    """Largest multiple-of-8 batch tile (<=1024) fitting the VMEM budget.

    Returns None if even a minimal tile does not fit (caller should K-tile D).
    """
    b_rows = _round_up(max(B, _SUBLANE), _SUBLANE)
    # Constant-index weights/biases are single-buffered (pl.Buffered(1)).
    fixed = (D * Hp + Hp * Op) * w_bytes + (Hp + Op) * 4
    # Per-row: double-buffered x / out tiles + in-kernel f32 h, its cast copy
    # for the second matmul, and the f32 y temporary.
    per_row = (2 * D * x_bytes + 2 * Op * out_bytes
               + Hp * 4 + Hp * w_bytes + Op * 4)
    if fixed + _SUBLANE * per_row > budget_bytes:
        return None
    bm = min(1024, b_rows)
    while bm > _SUBLANE and fixed + bm * per_row > budget_bytes:
        bm //= 2
    bm = max(_SUBLANE, (bm // _SUBLANE) * _SUBLANE)
    # Only split a single-tile batch when there are >=2 TensorCores to use.
    if num_cores >= 2 and b_rows >= 2 * _SUBLANE and bm >= b_rows:
        bm = _round_up(pl.cdiv(b_rows, 2), _SUBLANE)
    return bm


def _pick_k_tiling(B, D, Hp, Op, x_bytes, w_bytes, out_bytes, budget_bytes,
                   block_k=None):
    """(bm, tk) for the K-tiled path; tk is a multiple of 128 (layout-legal)."""
    b_rows = _round_up(max(B, _SUBLANE), _SUBLANE)
    fixed = Hp * Op * w_bytes + (Hp + Op) * 4          # resident W2 + biases

    def cost(bm, tk):
        per_row = (2 * tk * x_bytes + 2 * Op * out_bytes
                   + 2 * Hp * 4 + Hp * w_bytes + Op * 4)
        return fixed + 2 * tk * Hp * w_bytes + bm * per_row

    if block_k is not None:
        tk = max(_LANE, (int(block_k) // _LANE) * _LANE)
    else:
        tk = max(_LANE, min(_round_up(D, _LANE), 4 * _LANE))
    bm = min(512, b_rows)
    # Shrink the K tile first so the MXU M dimension (bm) stays large.
    while cost(bm, tk) > budget_bytes:
        if tk > _LANE:
            tk //= 2
        elif bm > _SUBLANE:
            bm //= 2
        else:
            break
    bm = max(_SUBLANE, (bm // _SUBLANE) * _SUBLANE)
    tk = max(_LANE, (tk // _LANE) * _LANE)
    return bm, tk


def _const_spec(shape, single_buffer):
    """BlockSpec for a VMEM-resident (constant index) operand."""
    idx = lambda *args: (0,) * len(shape)
    if single_buffer:
        return pl.BlockSpec(shape, idx, pipeline_mode=pl.Buffered(1))
    return pl.BlockSpec(shape, idx)


# ----------------------------------------------------------------------------
# pallas_call wrappers
# ----------------------------------------------------------------------------
def _call_single_shot(x_in, params, bm, odt, vmem_budget_bytes):
    B, D = x_in.shape
    Hp, Op = params["Hp"], params["Op"]
    grid = (pl.cdiv(B, bm),)

    def run(single_buffer):
        in_specs = [
            pl.BlockSpec((bm, D), lambda i: (i, 0)),          # x tile over batch
            _const_spec((D, Hp), single_buffer),               # W1 (resident)
            _const_spec((1, Hp), single_buffer),               # b1 (f32)
            _const_spec((Hp, Op), single_buffer),              # W2 (resident)
            _const_spec((1, Op), single_buffer),               # b2 (f32)
        ]
        return pl.pallas_call(
            _mlp_kernel,
            out_shape=jax.ShapeDtypeStruct((B, Op), odt),
            grid_spec=pltpu.PrefetchScalarGridSpec(
                num_scalar_prefetch=0,
                grid=grid,
                in_specs=in_specs,
                out_specs=pl.BlockSpec((bm, Op), lambda i: (i, 0)),
            ),
            compiler_params=pltpu.CompilerParams(
                dimension_semantics=("parallel",),
                vmem_limit_bytes=vmem_budget_bytes),
        )(x_in, params["w1"], params["b1"], params["w2"], params["b2"])

    try:
        return run(single_buffer=True)
    except Exception:
        # Fallback if this Pallas version rejects pl.Buffered(1) on inputs.
        return run(single_buffer=False)


def _call_ktiled(x_in, params, odt, vmem_budget_bytes, block_k):
    B, D = x_in.shape
    Hp, Op = params["Hp"], params["Op"]
    cdt = params["compute_dtype"]
    x_bytes = w_bytes = jnp.dtype(cdt).itemsize
    out_bytes = jnp.dtype(odt).itemsize

    bm, tk = _pick_k_tiling(B, D, Hp, Op, x_bytes, w_bytes, out_bytes,
                            vmem_budget_bytes, block_k)

    w1 = params["w1"]
    Dk = _round_up(D, tk)
    if Dk != D:
        # Zero-padded K columns contribute exactly 0 to the accumulator.
        # TODO(synk): cache this pad alongside prepare_mlp_params when the
        # K path is used repeatedly with a D that is not a multiple of tk.
        x_in = jnp.zeros((B, Dk), cdt).at[:, :D].set(x_in)
        w1 = jnp.zeros((Dk, Hp), cdt).at[:D, :].set(w1)

    grid = (pl.cdiv(B, bm), Dk // tk)   # reduction axis last, "arbitrary"

    def run(single_buffer):
        in_specs = [
            pl.BlockSpec((bm, tk), lambda i, k: (i, k)),       # x (B, K) tile
            pl.BlockSpec((tk, Hp), lambda i, k: (k, 0)),       # W1 K-slab
            _const_spec((1, Hp), single_buffer),               # b1
            _const_spec((Hp, Op), single_buffer),              # W2 (resident)
            _const_spec((1, Op), single_buffer),               # b2
        ]
        return pl.pallas_call(
            _mlp_kernel_ktiled,
            out_shape=jax.ShapeDtypeStruct((B, Op), odt),
            grid_spec=pltpu.PrefetchScalarGridSpec(
                num_scalar_prefetch=0,
                grid=grid,
                in_specs=in_specs,
                out_specs=pl.BlockSpec((bm, Op), lambda i, k: (i, 0)),
                scratch_shapes=[pltpu.VMEM((bm, Hp), jnp.float32)],
            ),
            compiler_params=pltpu.CompilerParams(
                dimension_semantics=("parallel", "arbitrary"),
                vmem_limit_bytes=vmem_budget_bytes),
        )(x_in, w1, params["b1"], params["w2"], params["b2"])

    try:
        return run(single_buffer=True)
    except Exception:
        return run(single_buffer=False)


# ----------------------------------------------------------------------------
# Public forward
# ----------------------------------------------------------------------------
def mlp_forward_prepared(x, params, *, out_dtype=None,
                         vmem_budget_bytes=None, block_k=None):
    """Fused MLP forward using parameters from prepare_mlp_params()."""
    B, D = x.shape
    assert D == params["D"], "input feature dim mismatch"
    O, Op = params["O"], params["Op"]
    Hp = params["Hp"]
    cdt = params["compute_dtype"]
    odt = jnp.dtype(out_dtype) if out_dtype is not None else x.dtype
    if vmem_budget_bytes is None:
        vmem_budget_bytes = _default_vmem_budget()

    x_in = x.astype(cdt)
    xb = wb = jnp.dtype(cdt).itemsize
    ob = jnp.dtype(odt).itemsize

    bm = None
    if block_k is None:
        bm = _pick_block_b(B, D, Hp, Op, xb, wb, ob, vmem_budget_bytes,
                           _num_tensorcores())

    if bm is not None:
        out = _call_single_shot(x_in, params, bm, odt, vmem_budget_bytes)
    else:
        out = _call_ktiled(x_in, params, odt, vmem_budget_bytes, block_k)

    # Only feature padding (if any) needs slicing; batch is never padded.
    if Op != O:
        out = out[:, :O]
    return out


def mlp_forward(x, w1, b1, w2, b2, *, compute_dtype=jnp.bfloat16,
                out_dtype=None, vmem_budget_bytes=None, block_k=None):
    """Convenience wrapper.  For repeated calls, run prepare_mlp_params once."""
    params = prepare_mlp_params(w1, b1, w2, b2, compute_dtype=compute_dtype)
    return mlp_forward_prepared(x, params, out_dtype=out_dtype,
                                vmem_budget_bytes=vmem_budget_bytes,
                                block_k=block_k)


def mlp_reference(x, w1, b1, w2, b2):
    h = x @ w1 + b1.reshape(1, -1)
    h = jnp.where(h > 0, h, 0.2 * h)
    return h @ w2 + b2.reshape(1, -1)


if __name__ == "__main__":
    # Module shapes: input_dim=32 -> hidden=16 -> output_dim=8.
    B, D, O = 64, 32, 8
    H = D // 2

    key = jax.random.PRNGKey(0)
    kx, kw1, kb1, kw2, kb2 = jax.random.split(key, 5)
    x = jax.random.normal(kx, (B, D), dtype=jnp.float32)
    # PyTorch nn.Linear stores [out, in]; we keep the transpose [in, out].
    w1 = jax.random.normal(kw1, (D, H), dtype=jnp.float32) * 0.1
    b1 = jax.random.normal(kb1, (1, H), dtype=jnp.float32) * 0.1
    w2 = jax.random.normal(kw2, (H, O), dtype=jnp.float32) * 0.1
    b2 = jax.random.normal(kb2, (1, O), dtype=jnp.float32) * 0.1

    ref = mlp_reference(x, w1, b1, w2, b2)

    # 1) f32 compute path (tight tolerance).
    params_f32 = prepare_mlp_params(w1, b1, w2, b2, compute_dtype=jnp.float32)
    out_f32 = mlp_forward_prepared(x, params_f32)
    jax.block_until_ready(out_f32)
    assert out_f32.shape == (B, O)
    assert jnp.allclose(out_f32, ref, atol=1e-5, rtol=1e-5), "f32 mismatch"

    # 2) Default bf16-MXU path with f32 accumulation (v6e/v7x recommended).
    params_bf16 = prepare_mlp_params(w1, b1, w2, b2)
    out_bf16 = mlp_forward_prepared(x, params_bf16)
    jax.block_until_ready(out_bf16)
    assert out_bf16.shape == (B, O)
    assert jnp.allclose(out_bf16, ref, atol=5e-2, rtol=5e-2), "bf16 mismatch"

    # 3) K-tiled (reduction over D) path, forced via block_k on a larger D.
    D2, H2 = 256, 128
    kx2, kw3, kb3, kw4, kb4 = jax.random.split(jax.random.PRNGKey(1), 5)
    x2 = jax.random.normal(kx2, (B, D2), dtype=jnp.float32)
    w3 = jax.random.normal(kw3, (D2, H2), dtype=jnp.float32) * 0.1
    b3 = jax.random.normal(kb3, (1, H2), dtype=jnp.float32) * 0.1
    w4 = jax.random.normal(kw4, (H2, O), dtype=jnp.float32) * 0.1
    b4 = jax.random.normal(kb4, (1, O), dtype=jnp.float32) * 0.1

    params2 = prepare_mlp_params(w3, b3, w4, b4)          # bf16 compute
    out_single2 = mlp_forward_prepared(x2, params2)       # single-shot path
    out_k2 = mlp_forward_prepared(x2, params2, block_k=128)  # forced K path
    jax.block_until_ready(out_k2)
    assert out_k2.shape == (B, O)
    # K-tiled vs single-shot (same dtype): only f32 accumulation-order differs.
    assert jnp.allclose(out_k2, out_single2, atol=2e-3, rtol=2e-3), "K-path mismatch"
    # Loose sanity check vs the f32 reference.
    ref2 = mlp_reference(x2, w3, b3, w4, b4)
    assert jnp.allclose(out_k2, ref2, atol=1.5e-1, rtol=1e-1), "K-path vs ref"

    print("KERNEL_OK")
</pallas_src>

<mosaic_0001>
module attributes {stable_mosaic.version = 11 : i64} {
  func.func @_mlp_kernel(%arg0: i32, %arg1: memref<64x32xf32, #tpu.memory_space<vmem>>, %arg2: memref<32x16xf32, #tpu.memory_space<vmem>>, %arg3: memref<1x16xf32, #tpu.memory_space<vmem>>, %arg4: memref<16x8xf32, #tpu.memory_space<vmem>>, %arg5: memref<1x8xf32, #tpu.memory_space<vmem>>, %arg6: memref<64x8xf32, #tpu.memory_space<vmem>>) attributes {dimension_semantics = [#tpu.dimension_semantics<parallel>], iteration_bounds = array<i64: 1>, scalar_prefetch = 0 : i64, scratch_operands = 0 : i64, tpu.core_type = #tpu.core_type<tc>, window_params = [{transform_indices = @transform_0, window_bounds = array<i64: 64, 32>}, {pipeline_mode = #tpu.pipeline_mode<synchronous>, transform_indices = @transform_1, window_bounds = array<i64: 32, 16>}, {pipeline_mode = #tpu.pipeline_mode<synchronous>, transform_indices = @transform_2, window_bounds = array<i64: 1, 16>}, {pipeline_mode = #tpu.pipeline_mode<synchronous>, transform_indices = @transform_3, window_bounds = array<i64: 16, 8>}, {pipeline_mode = #tpu.pipeline_mode<synchronous>, transform_indices = @transform_4, window_bounds = array<i64: 1, 8>}, {transform_indices = @transform_5, window_bounds = array<i64: 64, 8>}]} {
    %c0 = arith.constant 0 : index
    %c0_0 = arith.constant 0 : index
    %0 = vector.load %arg1[%c0, %c0_0] : memref<64x32xf32, #tpu.memory_space<vmem>>, vector<64x32xf32>
    %c0_1 = arith.constant 0 : index
    %c0_2 = arith.constant 0 : index
    %1 = vector.load %arg2[%c0_1, %c0_2] : memref<32x16xf32, #tpu.memory_space<vmem>>, vector<32x16xf32>
    %cst = arith.constant dense<0.000000e+00> : vector<64x16xf32>
    %2 = tpu.matmul %0, %1, %cst {dimension_numbers = #tpu.dot_dimension_numbers<[1], [0], [0], [1], [0, 0, 1, 1], [], []>} : vector<64x32xf32>, vector<32x16xf32>, vector<64x16xf32> -> vector<64x16xf32>
    %c0_3 = arith.constant 0 : index
    %c0_4 = arith.constant 0 : index
    %3 = vector.load %arg3[%c0_3, %c0_4] : memref<1x16xf32, #tpu.memory_space<vmem>>, vector<1x16xf32>
    %4 = vector.broadcast %3 : vector<1x16xf32> to vector<64x16xf32>
    %5 = arith.addf %2, %4 : vector<64x16xf32>
    %cst_5 = arith.constant 0.000000e+00 : f32
    %6 = vector.broadcast %cst_5 : f32 to vector<64x16xf32>
    %7 = arith.cmpf ogt, %5, %6 : vector<64x16xf32>
    %cst_6 = arith.constant 2.000000e-01 : f32
    %8 = vector.broadcast %cst_6 : f32 to vector<64x16xf32>
    %9 = arith.mulf %8, %5 : vector<64x16xf32>
    %10 = arith.select %7, %5, %9 : vector<64x16xi1>, vector<64x16xf32>
    %c0_7 = arith.constant 0 : index
    %c0_8 = arith.constant 0 : index
    %11 = vector.load %arg4[%c0_7, %c0_8] : memref<16x8xf32, #tpu.memory_space<vmem>>, vector<16x8xf32>
    %cst_9 = arith.constant dense<0.000000e+00> : vector<64x8xf32>
    %12 = tpu.matmul %10, %11, %cst_9 {dimension_numbers = #tpu.dot_dimension_numbers<[1], [0], [0], [1], [0, 0, 1, 1], [], []>} : vector<64x16xf32>, vector<16x8xf32>, vector<64x8xf32> -> vector<64x8xf32>
    %c0_10 = arith.constant 0 : index
    %c0_11 = arith.constant 0 : index
    %13 = vector.load %arg5[%c0_10, %c0_11] : memref<1x8xf32, #tpu.memory_space<vmem>>, vector<1x8xf32>
    %14 = vector.broadcast %13 : vector<1x8xf32> to vector<64x8xf32>
    %15 = arith.addf %12, %14 : vector<64x8xf32>
    %c0_12 = arith.constant 0 : index
    %c0_13 = arith.constant 0 : index
    %16 = vector.load %arg6[%c0_12, %c0_13] : memref<64x8xf32, #tpu.memory_space<vmem>>, vector<64x8xf32>
    tpu.vector_store %arg6[%c0_12, %c0_13], %15 {strides = array<i32>} : memref<64x8xf32, #tpu.memory_space<vmem>>, vector<64x8xf32>,
    return
  }
  func.func @transform_0(%arg0: i32) -> (i32, i32) {
    %c0_i32 = arith.constant 0 : i32
    %c0_i32_0 = arith.constant 0 : i32
    return %arg0, %c0_i32 : i32, i32
  }
  func.func @transform_1(%arg0: i32) -> (i32, i32) {
    %c0_i32 = arith.constant 0 : i32
    %c0_i32_0 = arith.constant 0 : i32
    %c0_i32_1 = arith.constant 0 : i32
    return %c0_i32, %c0_i32_0 : i32, i32
  }
  func.func @transform_2(%arg0: i32) -> (i32, i32) {
    %c0_i32 = arith.constant 0 : i32
    %c0_i32_0 = arith.constant 0 : i32
    %c0_i32_1 = arith.constant 0 : i32
    return %c0_i32, %c0_i32_0 : i32, i32
  }
  func.func @transform_3(%arg0: i32) -> (i32, i32) {
    %c0_i32 = arith.constant 0 : i32
    %c0_i32_0 = arith.constant 0 : i32
    %c0_i32_1 = arith.constant 0 : i32
    return %c0_i32, %c0_i32_0 : i32, i32
  }
  func.func @transform_4(%arg0: i32) -> (i32, i32) {
    %c0_i32 = arith.constant 0 : i32
    %c0_i32_0 = arith.constant 0 : i32
    %c0_i32_1 = arith.constant 0 : i32
    return %c0_i32, %c0_i32_0 : i32, i32
  }
  func.func @transform_5(%arg0: i32) -> (i32, i32) {
    %c0_i32 = arith.constant 0 : i32
    %c0_i32_0 = arith.constant 0 : i32
    return %arg0, %c0_i32 : i32, i32
  }
}

module attributes {stable_mosaic.version = 11 : i64} {
  func.func @_mlp_kernel(%arg0: i32, %arg1: memref<64x32xf32, #tpu.memory_space<vmem>>, %arg2: memref<32x16xf32, #tpu.memory_space<vmem>>, %arg3: memref<1x16xf32, #tpu.memory_space<vmem>>, %arg4: memref<16x8xf32, #tpu.memory_space<vmem>>, %arg5: memref<1x8xf32, #tpu.memory_space<vmem>>, %arg6: memref<64x8xf32, #tpu.memory_space<vmem>>) attributes {dimension_semantics = [#tpu.dimension_semantics<parallel>], iteration_bounds = array<i64: 1>, scalar_prefetch = 0 : i64, scratch_operands = 0 : i64, tpu.core_type = #tpu.core_type<tc>, window_params = [{transform_indices = @transform_0, window_bounds = array<i64: 64, 32>}, {pipeline_mode = #tpu.pipeline_mode<synchronous>, transform_indices = @transform_1, window_bounds = array<i64: 32, 16>}, {pipeline_mode = #tpu.pipeline_mode<synchronous>, transform_indices = @transform_2, window_bounds = array<i64: 1, 16>}, {pipeline_mode = #tpu.pipeline_mode<synchronous>, transform_indices = @transform_3, window_bounds = array<i64: 16, 8>}, {pipeline_mode = #tpu.pipeline_mode<synchronous>, transform_indices = @transform_4, window_bounds = array<i64: 1, 8>}, {transform_indices = @transform_5, window_bounds = array<i64: 64, 8>}]} {
    %c0 = arith.constant 0 : index
    %c0_0 = arith.constant 0 : index
    %0 = vector.load %arg1[%c0, %c0_0] : memref<64x32xf32, #tpu.memory_space<vmem>>, vector<64x32xf32>
    %c0_1 = arith.constant 0 : index
    %c0_2 = arith.constant 0 : index
    %1 = vector.load %arg2[%c0_1, %c0_2] : memref<32x16xf32, #tpu.memory_space<vmem>>, vector<32x16xf32>
    %cst = arith.constant dense<0.000000e+00> : vector<64x16xf32>
    %2 = tpu.matmul %0, %1, %cst {dimension_numbers = #tpu.dot_dimension_numbers<[1], [0], [0], [1], [0, 0, 1, 1], [], []>} : vector<64x32xf32>, vector<32x16xf32>, vector<64x16xf32> -> vector<64x16xf32>
    %c0_3 = arith.constant 0 : index
    %c0_4 = arith.constant 0 : index
    %3 = vector.load %arg3[%c0_3, %c0_4] : memref<1x16xf32, #tpu.memory_space<vmem>>, vector<1x16xf32>
    %4 = vector.broadcast %3 : vector<1x16xf32> to vector<64x16xf32>
    %5 = arith.addf %2, %4 : vector<64x16xf32>
    %cst_5 = arith.constant 0.000000e+00 : f32
    %6 = vector.broadcast %cst_5 : f32 to vector<64x16xf32>
    %7 = arith.cmpf ogt, %5, %6 : vector<64x16xf32>
    %cst_6 = arith.constant 2.000000e-01 : f32
    %8 = vector.broadcast %cst_6 : f32 to vector<64x16xf32>
    %9 = arith.mulf %8, %5 : vector<64x16xf32>
    %10 = arith.select %7, %5, %9 : vector<64x16xi1>, vector<64x16xf32>
    %c0_7 = arith.constant 0 : index
    %c0_8 = arith.constant 0 : index
    %11 = vector.load %arg4[%c0_7, %c0_8] : memref<16x8xf32, #tpu.memory_space<vmem>>, vector<16x8xf32>
    %cst_9 = arith.constant dense<0.000000e+00> : vector<64x8xf32>
    %12 = tpu.matmul %10, %11, %cst_9 {dimension_numbers = #tpu.dot_dimension_numbers<[1], [0], [0], [1], [0, 0, 1, 1], [], []>} : vector<64x16xf32>, vector<16x8xf32>, vector<64x8xf32> -> vector<64x8xf32>
    %c0_10 = arith.constant 0 : index
    %c0_11 = arith.constant 0 : index
    %13 = vector.load %arg5[%c0_10, %c0_11] : memref<1x8xf32, #tpu.memory_space<vmem>>, vector<1x8xf32>
    %14 = vector.broadcast %13 : vector<1x8xf32> to vector<64x8xf32>
    %15 = arith.addf %12, %14 : vector<64x8xf32>
    %c0_12 = arith.constant 0 : index
    %c0_13 = arith.constant 0 : index
    %16 = vector.load %arg6[%c0_12, %c0_13] : memref<64x8xf32, #tpu.memory_space<vmem>>, vector<64x8xf32>
    tpu.vector_store %arg6[%c0_12, %c0_13], %15 {strides = array<i32>} : memref<64x8xf32, #tpu.memory_space<vmem>>, vector<64x8xf32>,
    return
  }
  func.func @transform_0(%arg0: i32) -> (i32, i32) {
    %c0_i32 = arith.constant 0 : i32
    %c0_i32_0 = arith.constant 0 : i32
    return %arg0, %c0_i32 : i32, i32
  }
  func.func @transform_1(%arg0: i32) -> (i32, i32) {
    %c0_i32 = arith.constant 0 : i32
    %c0_i32_0 = arith.constant 0 : i32
    %c0_i32_1 = arith.constant 0 : i32
    return %c0_i32, %c0_i32_0 : i32, i32
  }
  func.func @transform_2(%arg0: i32) -> (i32, i32) {
    %c0_i32 = arith.constant 0 : i32
    %c0_i32_0 = arith.constant 0 : i32
    %c0_i32_1 = arith.constant 0 : i32
    return %c0_i32, %c0_i32_0 : i32, i32
  }
  func.func @transform_3(%arg0: i32) -> (i32, i32) {
    %c0_i32 = arith.constant 0 : i32
    %c0_i32_0 = arith.constant 0 : i32
    %c0_i32_1 = arith.constant 0 : i32
    return %c0_i32, %c0_i32_0 : i32, i32
  }
  func.func @transform_4(%arg0: i32) -> (i32, i32) {
    %c0_i32 = arith.constant 0 : i32
    %c0_i32_0 = arith.constant 0 : i32
    %c0_i32_1 = arith.constant 0 : i32
    return %c0_i32, %c0_i32_0 : i32, i32
  }
  func.func @transform_5(%arg0: i32) -> (i32, i32) {
    %c0_i32 = arith.constant 0 : i32
    %c0_i32_0 = arith.constant 0 : i32
    return %arg0, %c0_i32 : i32, i32
  }
}

</mosaic_0001>

<bundles_post_ra>
// kernel: tpu_custom_call.1
= control target key start
LH: loop header
LB: loop body
LE: loop exit
PB: predicated region body
PF: predicated region fallthrough
CT: control target
= control target key end

     0   :  { %10 = vsyncpa [#allocation3], 0  ;;  %s814_s0 = inlined_call_operand.hbm [shape: f32[64,32], index: 0, kind: input, shape index: {}]   ;;  %s815_s1 = inlined_call_operand.hbm [shape: f32[32,16], index: 1, kind: input, shape index: {}]   ;;  %s816_s2 = inlined_call_operand.hbm [shape: f32[1,16], index: 2, kind: input, shape index: {}]   ;;  %s817_s3 = inlined_call_operand.hbm [shape: f32[16,8], index: 3, kind: input, shape index: {}]   ;;  %s818_s4 = inlined_call_operand.hbm [shape: f32[1,8], index: 4, kind: input, shape index: {}]   ;;  %s819_s5 = inlined_call_operand.hbm [shape: f32[64,8], index: 5, kind: output, shape index: {}]  }
   0x1   :  { %11 = vsyncpa [#allocation6], 0 }
   0x2   :  { %12 = vsyncpa [#allocation9], 0 }
   0x3   :  { %13 = vsyncpa [#allocation4], 0  ;;  %s661_s18 = smov [#allocation5]   ;;  %s662_s20 = smov [#allocation8]  }
   0x4   :  { %s31_s19 = sshll.u32 %s661_s18, 4  ;;  %s53_s21 = sshll.u32 %s662_s20, 4  ;;  %s32_s19 = int_to_ptr.vmem [resolvable:$true] %s31_s19  ;;  %s699_s21 = int_to_ptr.vmem [resolvable:$true] %s53_s21 }
   0x5   :  { %s521_s24 = scalar_lea.hbm %s815_s1, 512 }
   0x6   :  { %p522_p0 = scmp.ne.s32.totalorder %s815_s1, %s521_s24  ;;  %p525_p1 = scmp.lt.u32.totalorder %s521_s24, %s815_s1 }
   0x8   :  { %p527_p2 = pnand %p525_p1, %p522_p0 }
   0xa   :  { %530 = shalt.err (!%p527_p2)
}
   0xb   :  { %s531_s29 = scalar_lea.vmem %s32_s19, 512  ;;  %p536_p4 = scmp.lt.s32.totalorder %s32_s19, %s32_s19 }
   0xc   :  { %p532_p3 = scmp.ne.s32.totalorder %s32_s19, %s531_s29  ;;  %p537_p5 = scmp.lt.s32.totalorder %s531_s29, %s531_s29 }
   0xe   :  { %p538_p6 = por %p537_p5, %p536_p4 }
  0x10   :  { %p539_p7 = pnand %p538_p6, %p532_p3 }
  0x12   :  { %542 = shalt.err (!%p539_p7)
}
  0x13   :  { %s663_s30 = smov 128   ;;  %s664_s6 = smov 8  }
  0x14   :  { %37 = dma.hbm_to_vmem [thread:$0]  %s815_s1, 512, %s32_s19, [#allocation6], %s663_s30, %s663_s30, %s664_s6  }
  0x15   :  { %s543_s11 = scalar_lea.hbm %s817_s3, 256 }
  0x16   :  { %p544_p8 = scmp.ne.s32.totalorder %s817_s3, %s543_s11  ;;  %p547_p9 = scmp.lt.u32.totalorder %s543_s11, %s817_s3 }
  0x18   :  { %p549_p10 = pnand %p547_p9, %p544_p8 }
  0x1a   :  { %552 = shalt.err (!%p549_p10)
}
  0x1b   :  { %s553_s16 = scalar_lea.vmem %s699_s21, 256  ;;  %p558_p12 = scmp.lt.s32.totalorder %s699_s21, %s699_s21 }
  0x1c   :  { %p554_p11 = scmp.ne.s32.totalorder %s699_s21, %s553_s16  ;;  %p559_p13 = scmp.lt.s32.totalorder %s553_s16, %s553_s16 }
  0x1e   :  { %p560_p0 = por %p559_p13, %p558_p12 }
  0x20   :  { %p561_p1 = pnand %p560_p0, %p554_p11 }
  0x22   :  { %564 = shalt.err (!%p561_p1)
}
  0x23   :  { %59 = dma.hbm_to_vmem [thread:$0]  %s817_s3, 256, %s699_s21, [#allocation9], %s663_s30, %s663_s30, %s664_s6  }
  0x24   :  { %s665_s18 = smov [#allocation2]   ;;  %s666_s20 = smov [#allocation7]  }
  0x25   :  { %s19_s19 = sshll.u32 %s665_s18, 4  ;;  %s44_s22 = sshll.u32 %s666_s20, 4  ;;  %s20_s19 = int_to_ptr.vmem [resolvable:$true] %s19_s19  ;;  %s45_s22 = int_to_ptr.vmem [resolvable:$true] %s44_s22 }
  0x26   :  { %s565_s25 = scalar_lea.hbm %s814_s0, 1024 }
  0x27   :  { %p566_p2 = scmp.ne.s32.totalorder %s814_s0, %s565_s25  ;;  %p569_p3 = scmp.lt.u32.totalorder %s565_s25, %s814_s0 }
  0x29   :  { %p571_p4 = pnand %p569_p3, %p566_p2 }
  0x2b   :  { %574 = shalt.err (!%p571_p4)
}
  0x2c   :  { %s575_s3 = scalar_lea.vmem %s20_s19, 1024  ;;  %p580_p6 = scmp.lt.s32.totalorder %s20_s19, %s20_s19 }
  0x2d   :  { %p576_p5 = scmp.ne.s32.totalorder %s20_s19, %s575_s3  ;;  %p581_p7 = scmp.lt.s32.totalorder %s575_s3, %s575_s3 }
  0x2f   :  { %p582_p8 = por %p581_p7, %p580_p6 }
  0x31   :  { %p583_p9 = pnand %p582_p8, %p576_p5 }
  0x33   :  { %586 = shalt.err (!%p583_p9)
}
  0x34   :  { %25 = dma.hbm_to_vmem [thread:$0]  %s814_s0, 1024, %s20_s19, [#allocation3], %s663_s30, %s663_s30, %s664_s6  }
  0x35   :  { %s587_s10 = scalar_lea.hbm %s816_s2, 16 }
  0x36   :  { %p588_p10 = scmp.ne.s32.totalorder %s816_s2, %s587_s10  ;;  %p591_p11 = scmp.lt.u32.totalorder %s587_s10, %s816_s2 }
  0x38   :  { %p593_p12 = pnand %p591_p11, %p588_p10 }
  0x3a   :  { %596 = shalt.err (!%p593_p12)
}
  0x3b   :  { %s597_s15 = scalar_lea.vmem %s45_s22, 16  ;;  %s601_s16 = scalar_lea.vmem %s45_s22, 32 }
  0x3c   :  { %p598_p13 = scmp.ne.s32.totalorder %s45_s22, %s597_s15  ;;  %p602_p0 = scmp.lt.s32.totalorder %s45_s22, %s45_s22 }
  0x3d   :  { %p603_p1 = scmp.lt.s32.totalorder %s601_s16, %s597_s15 }
  0x3f   :  { %p604_p2 = por %p603_p1, %p602_p0 }
  0x41   :  { %p605_p3 = pnand %p604_p2, %p598_p13 }
  0x43   :  { %608 = shalt.err (!%p605_p3)
}
  0x44   :  { %47 = dma.hbm_to_vmem [thread:$0]  %s816_s2, 16, %s45_s22, [#allocation6]  }
  0x45   :  { %s667_s17 = smov [#allocation10]   ;;  %s609_s23 = scalar_lea.hbm %s818_s4, 16 }
  0x46   :  { %s66_s18 = sshll.u32 %s667_s17, 4  ;;  %p610_p4 = scmp.ne.s32.totalorder %s818_s4, %s609_s23  ;;  %s67_s18 = int_to_ptr.vmem [resolvable:$true] %s66_s18 }
  0x47   :  { %p613_p5 = scmp.lt.u32.totalorder %s609_s23, %s818_s4 }
  0x49   :  { %p615_p6 = pnand %p613_p5, %p610_p4 }
  0x4b   :  { %618 = shalt.err (!%p615_p6)
}
  0x4c   :  { %s619_s28 = scalar_lea.vmem %s67_s18, 16  ;;  %s623_s2 = scalar_lea.vmem %s67_s18, 32 }
  0x4d   :  { %p620_p7 = scmp.ne.s32.totalorder %s67_s18, %s619_s28  ;;  %p624_p8 = scmp.lt.s32.totalorder %s67_s18, %s67_s18 }
  0x4e   :  { %p625_p9 = scmp.lt.s32.totalorder %s623_s2, %s619_s28 }
  0x50   :  { %p626_p10 = por %p625_p9, %p624_p8 }
  0x52   :  { %p627_p11 = pnand %p626_p10, %p620_p7 }
  0x54   :  { %630 = shalt.err (!%p627_p11)
}
  0x55   :  { %69 = dma.hbm_to_vmem [thread:$0]  %s818_s4, 16, %s67_s18, [#allocation9]  }
  0x56   :  { %653 = dma.done.wait [#allocation3], 1024  }
  0x57   :  { %654 = vsyncadd [#allocation3], 4294966272 }
  0x58   :  { %655 = dma.done.wait [#allocation6], 528  }
  0x59   :  { %656 = vsyncadd [#allocation6], 4294966768 }
  0x5a   :  { %657 = dma.done.wait [#allocation9], 272  }
  0x5b   :  { %658 = vsyncadd [#allocation9], 4294967024  ;;  %vm104_vm0 = vcmask 261120   ;;  %v93_v0 = vld [vmem:[#allocation5] sm:$0xff]  ;;  %v94_v1 = vld [vmem:[#allocation5 + $0x8] sm:$0xff]  ;;  %vm267_vm3 = vcmask 130048  }
  0x5c   :  { %v95_v2 = vld [vmem:[#allocation5 + $0x10] sm:$0xff]  ;;  %v501_v3 = vpack.c.bf16 %v94_v1, %v93_v0  ;;  %v96_v4 = vld [vmem:[#allocation5 + $0x18] sm:$0xff]  ;;  %v85_v5 = vld [vmem:[#allocation2] sm:$0xff]  ;;  %vm397_vm10 = vcmask 64512   ;;  %s668_s4 = smov [#allocation11]  }
  0x5d   :  { %v505_v6 = vpack.c.bf16 %v96_v4, %v95_v2  ;;  %473 = vmatprep.mubr.msk.f32.mxu0 %vm104_vm0, %v85_v5  ;;  %v86_v7 = vld [vmem:[#allocation2 + $0x8] sm:$0xff]  ;;  %v87_v8 = vld [vmem:[#allocation2 + $0x10] sm:$0xff]  ;;  %v88_v9 = vld [vmem:[#allocation2 + $0x18] sm:$0xff]  ;;  %s411_s3 = sshll.u32 %s668_s4, 4  ;;  %s412_s3 = int_to_ptr.vmem [resolvable:$true] %s411_s3 }
  0x5e   :  { %502 = vmatprep.subr.bf16.mxu0 %v501_v3  ;;  %v89_v10 = vld [vmem:[#allocation2 + $0x20] sm:$0xff]  ;;  %v90_v11 = vld [vmem:[#allocation2 + $0x28] sm:$0xff]  ;;  %v91_v12 = vld [vmem:[#allocation2 + $0x30] sm:$0xff]  ;;  %s631_s21 = scalar_lea.vmem %s412_s3, 1024  ;;  %p636_p13 = scmp.lt.s32.totalorder %s412_s3, %s412_s3 }
  0x5f   :  { %504 = vmatpush3.bf16.msra.mxu0 %v501_v3  ;;  %v92_v13 = vld [vmem:[#allocation2 + $0x38] sm:$0xff]  ;;  %v258_v14 = vld [vmem:[#allocation8] sm:$0xff]  ;;  %v259_v15 = vld [vmem:[#allocation8 + $0x8] sm:$0xff]  ;;  %p632_p12 = scmp.ne.s32.totalorder %s412_s3, %s631_s21  ;;  %p637_p0 = scmp.lt.s32.totalorder %s631_s21, %s631_s21 }
  0x60   :  { %506 = vmatprep.subr.bf16.mxu0 %v505_v6  ;;  %v509_v16 = vpack.c.bf16 %v259_v15, %v258_v14  ;;  %v425_v17 = vld [vmem:[#allocation7] ss:$0 sm:$0xff]  ;;  %v434_v50 = vld [vmem:[#allocation10] ss:$0 sm:$0xff] }
  0x61   :  { %p638_p1 = por %p637_p0, %p636_p13 }
  0x62   :  { %510 = vmatprep.subr.bf16.mxu1 %v509_v16 }
  0x63   :  { %508 = vmatpush3.bf16.msra.mxu0 %v505_v6  ;;  %512 = vmatpush3.bf16.msra.mxu1 %v509_v16  ;;  %p639_p2 = pnand %p638_p1, %p632_p12 }
  0x66   :  { %474 = vmatmul.mubr.msk.f32.vlgmr.msra.gmra.mrb[0].mxu0 %vm104_vm0, %v86_v7 }
  0x67   :  { %476 = vmatprep.mubr.msk.f32.mxu0 %vm104_vm0, %v87_v8 }
  0x6a   :  { %477 = vmatmul.mubr.msk.f32.gmra.mrb[2].mxu0 %vm104_vm0, %v88_v9 }
  0x6b   :  { %479 = vmatprep.mubr.msk.f32.mxu0 %vm104_vm0, %v89_v10 }
  0x6e   :  { %480 = vmatmul.mubr.msk.f32.gmra.mrb[4].mxu0 %vm104_vm0, %v90_v11 }
  0x6f   :  { %482 = vmatprep.mubr.msk.f32.mxu0 %vm104_vm0, %v91_v12 }
  0x72   :  { %483 = vmatmul.mubr.msk.f32.gmra.mrb[6].mxu0 %vm104_vm0, %v92_v13 }
 0x139   :  { %v475_v18 = vpop.f32.mrb[0].mxu0 }
 0x13a   :  { %v201_v19 = vadd.f32 %v475_v18, %v425_v17  ;;  %v195_v20 = vpop.f32.mrb[1].mxu0 }
 0x13b   :  { %v196_v21 = vadd.f32 %v425_v17, %v195_v20 }
 0x13c   :  { %v243_v22 = vmul.f32 0.2, %v201_v19  ;;  %vm235_vm1 = vcmp.gt.f32.partialorder %v201_v19, 0.0 }
 0x13d   :  { %v478_v23 = vpop.f32.mrb[2].mxu0  ;;  %vm234_vm2 = vcmp.gt.f32.partialorder %v196_v21, 0.0  ;;  %v242_v24 = vmul.f32 0.2, %v196_v21 }
 0x13e   :  { %v211_v25 = vadd.f32 %v478_v23, %v425_v17  ;;  %v205_v26 = vpop.f32.mrb[3].mxu0  ;;  %v251_v30 = vsel %vm235_vm1, %v201_v19, %v243_v22 }
 0x13f   :  { %v206_v27 = vadd.f32 %v425_v17, %v205_v26  ;;  %v250_v28 = vsel %vm234_vm2, %v196_v21, %v242_v24 }
 0x140   :  { %v245_v29 = vmul.f32 0.2, %v211_v25  ;;  %489 = vmatprep.mubr.msk.f32.mxu1 %vm267_vm3, %v250_v28  ;;  %vm237_vm4 = vcmp.gt.f32.partialorder %v211_v25, 0.0 }
 0x141   :  { %vm236_vm5 = vcmp.gt.f32.partialorder %v206_v27, 0.0  ;;  %v244_v31 = vmul.f32 0.2, %v206_v27  ;;  %v481_v32 = vpop.f32.mrb[4].mxu0  ;;  %490 = vmatmul.mubr.msk.f32.vlgmr.msra.gmra.mrb[0].mxu1 %vm267_vm3, %v251_v30 }
 0x142   :  { %v221_v33 = vadd.f32 %v481_v32, %v425_v17  ;;  %v215_v34 = vpop.f32.mrb[5].mxu0  ;;  %v253_v38 = vsel %vm237_vm4, %v211_v25, %v245_v29 }
 0x143   :  { %v216_v35 = vadd.f32 %v425_v17, %v215_v34  ;;  %v252_v36 = vsel %vm236_vm5, %v206_v27, %v244_v31 }
 0x144   :  { %v247_v37 = vmul.f32 0.2, %v221_v33  ;;  %492 = vmatprep.mubr.msk.f32.mxu1 %vm267_vm3, %v252_v36  ;;  %vm239_vm6 = vcmp.gt.f32.partialorder %v221_v33, 0.0 }
 0x145   :  { %vm238_vm7 = vcmp.gt.f32.partialorder %v216_v35, 0.0  ;;  %v246_v39 = vmul.f32 0.2, %v216_v35  ;;  %v484_v40 = vpop.f32.mrb[6].mxu0  ;;  %493 = vmatmul.mubr.msk.f32.gmra.mrb[2].mxu1 %vm267_vm3, %v253_v38 }
 0x146   :  { %v231_v41 = vadd.f32 %v484_v40, %v425_v17  ;;  %v225_v42 = vpop.f32.mrb[7].mxu0  ;;  %v255_v46 = vsel %vm239_vm6, %v221_v33, %v247_v37 }
 0x147   :  { %v226_v43 = vadd.f32 %v425_v17, %v225_v42  ;;  %v254_v44 = vsel %vm238_vm7, %v216_v35, %v246_v39 }
 0x148   :  { %v249_v45 = vmul.f32 0.2, %v231_v41  ;;  %495 = vmatprep.mubr.msk.f32.mxu1 %vm267_vm3, %v254_v44  ;;  %vm241_vm8 = vcmp.gt.f32.partialorder %v231_v41, 0.0 }
 0x149   :  { %vm240_vm9 = vcmp.gt.f32.partialorder %v226_v43, 0.0  ;;  %v248_v47 = vmul.f32 0.2, %v226_v43  ;;  %496 = vmatmul.mubr.msk.f32.gmra.mrb[4].mxu1 %vm267_vm3, %v255_v46 }
 0x14a   :  { %v257_v49 = vsel %vm241_vm8, %v231_v41, %v249_v45 }
 0x14b   :  { %v256_v48 = vsel %vm240_vm9, %v226_v43, %v248_v47 }
 0x14c   :  { %498 = vmatprep.mubr.msk.f32.mxu1 %vm267_vm3, %v256_v48 }
 0x14d   :  { %499 = vmatmul.mubr.msk.f32.gmra.mrb[6].mxu1 %vm267_vm3, %v257_v49 }
 0x214   :  { %v491_v51 = vpop.f32.mrb[0].mxu1 }
 0x215   :  { %v364_v52 = vadd.f32 %v491_v51, %v434_v50  ;;  %v358_v53 = vpop.f32.mrb[1].mxu1 }
 0x216   :  { %v359_v54 = vadd.f32 %v434_v50, %v358_v53 }
 0x217   :  { %399 = vst.msk [vmem:[#allocation11 + $0x8] sm:$0xff] %vm397_vm10, %v364_v52 }
 0x218   :  { %398 = vst.msk [vmem:[#allocation11] sm:$0xff] %vm397_vm10, %v359_v54  ;;  %v494_v55 = vpop.f32.mrb[2].mxu1 }
 0x219   :  { %v374_v56 = vadd.f32 %v494_v55, %v434_v50  ;;  %v368_v57 = vpop.f32.mrb[3].mxu1 }
 0x21a   :  { %v369_v58 = vadd.f32 %v434_v50, %v368_v57 }
 0x21b   :  { %401 = vst.msk [vmem:[#allocation11 + $0x18] sm:$0xff] %vm397_vm10, %v374_v56 }
 0x21c   :  { %400 = vst.msk [vmem:[#allocation11 + $0x10] sm:$0xff] %vm397_vm10, %v369_v58  ;;  %v497_v59 = vpop.f32.mrb[4].mxu1 }
 0x21d   :  { %v384_v60 = vadd.f32 %v497_v59, %v434_v50  ;;  %v378_v61 = vpop.f32.mrb[5].mxu1 }
 0x21e   :  { %v379_v62 = vadd.f32 %v434_v50, %v378_v61 }
 0x21f   :  { %403 = vst.msk [vmem:[#allocation11 + $0x28] sm:$0xff] %vm397_vm10, %v384_v60 }
 0x220   :  { %402 = vst.msk [vmem:[#allocation11 + $0x20] sm:$0xff] %vm397_vm10, %v379_v62  ;;  %v500_v63 = vpop.f32.mrb[6].mxu1 }
 0x221   :  { %v394_v0 = vadd.f32 %v500_v63, %v434_v50  ;;  %v388_v1 = vpop.f32.mrb[7].mxu1 }
 0x222   :  { %v389_v2 = vadd.f32 %v434_v50, %v388_v1 }
 0x223   :  { %405 = vst.msk [vmem:[#allocation11 + $0x38] sm:$0xff] %vm397_vm10, %v394_v0 }
 0x224   :  { %404 = vst.msk [vmem:[#allocation11 + $0x30] sm:$0xff] %vm397_vm10, %v389_v2 }
 0x225   :  { %642 = shalt.err (!%p639_p2)
}
 0x226   :  { %s643_s9 = scalar_lea.hbm %s819_s5, 1024 }
 0x227   :  { %p644_p3 = scmp.ne.s32.totalorder %s819_s5, %s643_s9  ;;  %p647_p4 = scmp.lt.u32.totalorder %s643_s9, %s819_s5 }
 0x229   :  { %p649_p5 = pnand %p647_p4, %p644_p3 }
 0x22b   :  { %652 = shalt.err (!%p649_p5)
}
 0x22c   :  { %417 = dma.vmem_to_hbm [thread:$0]  %s412_s3, 1024, %s819_s5, [#allocation4], %s663_s30, %s663_s30, %s664_s6  }
 0x22d   :  { %659 = dma.done.wait [#allocation4], 1024  }
 0x22e   :  { %660 = vsyncadd [#allocation4], 4294966272 }
 0x22f   :  { %421 = vsyncpa [#allocation3], 1 }
 0x230   :  { %422 = vsyncpa [#allocation6], 1 }
 0x231   :  { %423 = vsyncpa [#allocation9], 1 }
 0x232   :  { %424 = vsyncpa [#allocation4], 1 }

// kernel: tpu_custom_call.1
= control target key start
LH: loop header
LB: loop body
LE: loop exit
PB: predicated region body
PF: predicated region fallthrough
CT: control target
= control target key end

     0   :  { %10 = vsyncpa [#allocation3], 0  ;;  %s814_s0 = inlined_call_operand.hbm [shape: f32[64,32], index: 0, kind: input, shape index: {}]   ;;  %s815_s1 = inlined_call_operand.hbm [shape: f32[32,16], index: 1, kind: input, shape index: {}]   ;;  %s816_s2 = inlined_call_operand.hbm [shape: f32[1,16], index: 2, kind: input, shape index: {}]   ;;  %s817_s3 = inlined_call_operand.hbm [shape: f32[16,8], index: 3, kind: input, shape index: {}]   ;;  %s818_s4 = inlined_call_operand.hbm [shape: f32[1,8], index: 4, kind: input, shape index: {}]   ;;  %s819_s5 = inlined_call_operand.hbm [shape: f32[64,8], index: 5, kind: output, shape index: {}]  }
   0x1   :  { %11 = vsyncpa [#allocation6], 0 }
   0x2   :  { %12 = vsyncpa [#allocation9], 0 }
   0x3   :  { %13 = vsyncpa [#allocation4], 0  ;;  %s661_s18 = smov [#allocation5]   ;;  %s662_s20 = smov [#allocation8]  }
   0x4   :  { %s31_s19 = sshll.u32 %s661_s18, 4  ;;  %s53_s21 = sshll.u32 %s662_s20, 4  ;;  %s32_s19 = int_to_ptr.vmem [resolvable:$true] %s31_s19  ;;  %s699_s21 = int_to_ptr.vmem [resolvable:$true] %s53_s21 }
   0x5   :  { %s521_s24 = scalar_lea.hbm %s815_s1, 512 }
   0x6   :  { %p522_p0 = scmp.ne.s32.totalorder %s815_s1, %s521_s24  ;;  %p525_p1 = scmp.lt.u32.totalorder %s521_s24, %s815_s1 }
   0x8   :  { %p527_p2 = pnand %p525_p1, %p522_p0 }
   0xa   :  { %530 = shalt.err (!%p527_p2)
}
   0xb   :  { %s531_s29 = scalar_lea.vmem %s32_s19, 512  ;;  %p536_p4 = scmp.lt.s32.totalorder %s32_s19, %s32_s19 }
   0xc   :  { %p532_p3 = scmp.ne.s32.totalorder %s32_s19, %s531_s29  ;;  %p537_p5 = scmp.lt.s32.totalorder %s531_s29, %s531_s29 }
   0xe   :  { %p538_p6 = por %p537_p5, %p536_p4 }
  0x10   :  { %p539_p7 = pnand %p538_p6, %p532_p3 }
  0x12   :  { %542 = shalt.err (!%p539_p7)
}
  0x13   :  { %s663_s30 = smov 128   ;;  %s664_s6 = smov 8  }
  0x14   :  { %37 = dma.hbm_to_vmem [thread:$0]  %s815_s1, 512, %s32_s19, [#allocation6], %s663_s30, %s663_s30, %s664_s6  }
  0x15   :  { %s543_s11 = scalar_lea.hbm %s817_s3, 256 }
  0x16   :  { %p544_p8 = scmp.ne.s32.totalorder %s817_s3, %s543_s11  ;;  %p547_p9 = scmp.lt.u32.totalorder %s543_s11, %s817_s3 }
  0x18   :  { %p549_p10 = pnand %p547_p9, %p544_p8 }
  0x1a   :  { %552 = shalt.err (!%p549_p10)
}
  0x1b   :  { %s553_s16 = scalar_lea.vmem %s699_s21, 256  ;;  %p558_p12 = scmp.lt.s32.totalorder %s699_s21, %s699_s21 }
  0x1c   :  { %p554_p11 = scmp.ne.s32.totalorder %s699_s21, %s553_s16  ;;  %p559_p13 = scmp.lt.s32.totalorder %s553_s16, %s553_s16 }
  0x1e   :  { %p560_p0 = por %p559_p13, %p558_p12 }
  0x20   :  { %p561_p1 = pnand %p560_p0, %p554_p11 }
  0x22   :  { %564 = shalt.err (!%p561_p1)
}
  0x23   :  { %59 = dma.hbm_to_vmem [thread:$0]  %s817_s3, 256, %s699_s21, [#allocation9], %s663_s30, %s663_s30, %s664_s6  }
  0x24   :  { %s665_s18 = smov [#allocation2]   ;;  %s666_s20 = smov [#allocation7]  }
  0x25   :  { %s19_s19 = sshll.u32 %s665_s18, 4  ;;  %s44_s22 = sshll.u32 %s666_s20, 4  ;;  %s20_s19 = int_to_ptr.vmem [resolvable:$true] %s19_s19  ;;  %s45_s22 = int_to_ptr.vmem [resolvable:$true] %s44_s22 }
  0x26   :  { %s565_s25 = scalar_lea.hbm %s814_s0, 1024 }
  0x27   :  { %p566_p2 = scmp.ne.s32.totalorder %s814_s0, %s565_s25  ;;  %p569_p3 = scmp.lt.u32.totalorder %s565_s25, %s814_s0 }
  0x29   :  { %p571_p4 = pnand %p569_p3, %p566_p2 }
  0x2b   :  { %574 = shalt.err (!%p571_p4)
}
  0x2c   :  { %s575_s3 = scalar_lea.vmem %s20_s19, 1024  ;;  %p580_p6 = scmp.lt.s32.totalorder %s20_s19, %s20_s19 }
  0x2d   :  { %p576_p5 = scmp.ne.s32.totalorder %s20_s19, %s575_s3  ;;  %p581_p7 = scmp.lt.s32.totalorder %s575_s3, %s575_s3 }
  0x2f   :  { %p582_p8 = por %p581_p7, %p580_p6 }
  0x31   :  { %p583_p9 = pnand %p582_p8, %p576_p5 }
  0x33   :  { %586 = shalt.err (!%p583_p9)
}
  0x34   :  { %25 = dma.hbm_to_vmem [thread:$0]  %s814_s0, 1024, %s20_s19, [#allocation3], %s663_s30, %s663_s30, %s664_s6  }
  0x35   :  { %s587_s10 = scalar_lea.hbm %s816_s2, 16 }
  0x36   :  { %p588_p10 = scmp.ne.s32.totalorder %s816_s2, %s587_s10  ;;  %p591_p11 = scmp.lt.u32.totalorder %s587_s10, %s816_s2 }
  0x38   :  { %p593_p12 = pnand %p591_p11, %p588_p10 }
  0x3a   :  { %596 = shalt.err (!%p593_p12)
}
  0x3b   :  { %s597_s15 = scalar_lea.vmem %s45_s22, 16  ;;  %s601_s16 = scalar_lea.vmem %s45_s22, 32 }
  0x3c   :  { %p598_p13 = scmp.ne.s32.totalorder %s45_s22, %s597_s15  ;;  %p602_p0 = scmp.lt.s32.totalorder %s45_s22, %s45_s22 }
  0x3d   :  { %p603_p1 = scmp.lt.s32.totalorder %s601_s16, %s597_s15 }
  0x3f   :  { %p604_p2 = por %p603_p1, %p602_p0 }
  0x41   :  { %p605_p3 = pnand %p604_p2, %p598_p13 }
  0x43   :  { %608 = shalt.err (!%p605_p3)
}
  0x44   :  { %47 = dma.hbm_to_vmem [thread:$0]  %s816_s2, 16, %s45_s22, [#allocation6]  }
  0x45   :  { %s667_s17 = smov [#allocation10]   ;;  %s609_s23 = scalar_lea.hbm %s818_s4, 16 }
  0x46   :  { %s66_s18 = sshll.u32 %s667_s17, 4  ;;  %p610_p4 = scmp.ne.s32.totalorder %s818_s4, %s609_s23  ;;  %s67_s18 = int_to_ptr.vmem [resolvable:$true] %s66_s18 }
  0x47   :  { %p613_p5 = scmp.lt.u32.totalorder %s609_s23, %s818_s4 }
  0x49   :  { %p615_p6 = pnand %p613_p5, %p610_p4 }
  0x4b   :  { %618 = shalt.err (!%p615_p6)
}
  0x4c   :  { %s619_s28 = scalar_lea.vmem %s67_s18, 16  ;;  %s623_s2 = scalar_lea.vmem %s67_s18, 32 }
  0x4d   :  { %p620_p7 = scmp.ne.s32.totalorder %s67_s18, %s619_s28  ;;  %p624_p8 = scmp.lt.s32.totalorder %s67_s18, %s67_s18 }
  0x4e   :  { %p625_p9 = scmp.lt.s32.totalorder %s623_s2, %s619_s28 }
  0x50   :  { %p626_p10 = por %p625_p9, %p624_p8 }
  0x52   :  { %p627_p11 = pnand %p626_p10, %p620_p7 }
  0x54   :  { %630 = shalt.err (!%p627_p11)
}
  0x55   :  { %69 = dma.hbm_to_vmem [thread:$0]  %s818_s4, 16, %s67_s18, [#allocation9]  }
  0x56   :  { %653 = dma.done.wait [#allocation3], 1024  }
  0x57   :  { %654 = vsyncadd [#allocation3], 4294966272 }
  0x58   :  { %655 = dma.done.wait [#allocation6], 528  }
  0x59   :  { %656 = vsyncadd [#allocation6], 4294966768 }
  0x5a   :  { %657 = dma.done.wait [#allocation9], 272  }
  0x5b   :  { %658 = vsyncadd [#allocation9], 4294967024  ;;  %vm104_vm0 = vcmask 261120   ;;  %v93_v0 = vld [vmem:[#allocation5] sm:$0xff]  ;;  %v94_v1 = vld [vmem:[#allocation5 + $0x8] sm:$0xff]  ;;  %vm267_vm3 = vcmask 130048  }
  0x5c   :  { %v95_v2 = vld [vmem:[#allocation5 + $0x10] sm:$0xff]  ;;  %v501_v3 = vpack.c.bf16 %v94_v1, %v93_v0  ;;  %v96_v4 = vld [vmem:[#allocation5 + $0x18] sm:$0xff]  ;;  %v85_v5 = vld [vmem:[#allocation2] sm:$0xff]  ;;  %vm397_vm10 = vcmask 64512   ;;  %s668_s4 = smov [#allocation11]  }
  0x5d   :  { %v505_v6 = vpack.c.bf16 %v96_v4, %v95_v2  ;;  %473 = vmatprep.mubr.msk.f32.mxu0 %vm104_vm0, %v85_v5  ;;  %v86_v7 = vld [vmem:[#allocation2 + $0x8] sm:$0xff]  ;;  %v87_v8 = vld [vmem:[#allocation2 + $0x10] sm:$0xff]  ;;  %v88_v9 = vld [vmem:[#allocation2 + $0x18] sm:$0xff]  ;;  %s411_s3 = sshll.u32 %s668_s4, 4  ;;  %s412_s3 = int_to_ptr.vmem [resolvable:$true] %s411_s3 }
  0x5e   :  { %502 = vmatprep.subr.bf16.mxu0 %v501_v3  ;;  %v89_v10 = vld [vmem:[#allocation2 + $0x20] sm:$0xff]  ;;  %v90_v11 = vld [vmem:[#allocation2 + $0x28] sm:$0xff]  ;;  %v91_v12 = vld [vmem:[#allocation2 + $0x30] sm:$0xff]  ;;  %s631_s21 = scalar_lea.vmem %s412_s3, 1024  ;;  %p636_p13 = scmp.lt.s32.totalorder %s412_s3, %s412_s3 }
  0x5f   :  { %504 = vmatpush3.bf16.msra.mxu0 %v501_v3  ;;  %v92_v13 = vld [vmem:[#allocation2 + $0x38] sm:$0xff]  ;;  %v258_v14 = vld [vmem:[#allocation8] sm:$0xff]  ;;  %v259_v15 = vld [vmem:[#allocation8 + $0x8] sm:$0xff]  ;;  %p632_p12 = scmp.ne.s32.totalorder %s412_s3, %s631_s21  ;;  %p637_p0 = scmp.lt.s32.totalorder %s631_s21, %s631_s21 }
  0x60   :  { %506 = vmatprep.subr.bf16.mxu0 %v505_v6  ;;  %v509_v16 = vpack.c.bf16 %v259_v15, %v258_v14  ;;  %v425_v17 = vld [vmem:[#allocation7] ss:$0 sm:$0xff]  ;;  %v434_v50 = vld [vmem:[#allocation10] ss:$0 sm:$0xff] }
  0x61   :  { %p638_p1 = por %p637_p0, %p636_p13 }
  0x62   :  { %510 = vmatprep.subr.bf16.mxu1 %v509_v16 }
  0x63   :  { %508 = vmatpush3.bf16.msra.mxu0 %v505_v6  ;;  %512 = vmatpush3.bf16.msra.mxu1 %v509_v16  ;;  %p639_p2 = pnand %p638_p1, %p632_p12 }
  0x66   :  { %474 = vmatmul.mubr.msk.f32.vlgmr.msra.gmra.mrb[0].mxu0 %vm104_vm0, %v86_v7 }
  0x67   :  { %476 = vmatprep.mubr.msk.f32.mxu0 %vm104_vm0, %v87_v8 }
  0x6a   :  { %477 = vmatmul.mubr.msk.f32.gmra.mrb[2].mxu0 %vm104_vm0, %v88_v9 }
  0x6b   :  { %479 = vmatprep.mubr.msk.f32.mxu0 %vm104_vm0, %v89_v10 }
  0x6e   :  { %480 = vmatmul.mubr.msk.f32.gmra.mrb[4].mxu0 %vm104_vm0, %v90_v11 }
  0x6f   :  { %482 = vmatprep.mubr.msk.f32.mxu0 %vm104_vm0, %v91_v12 }
  0x72   :  { %483 = vmatmul.mubr.msk.f32.gmra.mrb[6].mxu0 %vm104_vm0, %v92_v13 }
 0x139   :  { %v475_v18 = vpop.f32.mrb[0].mxu0 }
 0x13a   :  { %v201_v19 = vadd.f32 %v475_v18, %v425_v17  ;;  %v195_v20 = vpop.f32.mrb[1].mxu0 }
 0x13b   :  { %v196_v21 = vadd.f32 %v425_v17, %v195_v20 }
 0x13c   :  { %v243_v22 = vmul.f32 0.2, %v201_v19  ;;  %vm235_vm1 = vcmp.gt.f32.partialorder %v201_v19, 0.0 }
 0x13d   :  { %v478_v23 = vpop.f32.mrb[2].mxu0  ;;  %vm234_vm2 = vcmp.gt.f32.partialorder %v196_v21, 0.0  ;;  %v242_v24 = vmul.f32 0.2, %v196_v21 }
 0x13e   :  { %v211_v25 = vadd.f32 %v478_v23, %v425_v17  ;;  %v205_v26 = vpop.f32.mrb[3].mxu0  ;;  %v251_v30 = vsel %vm235_vm1, %v201_v19, %v243_v22 }
 0x13f   :  { %v206_v27 = vadd.f32 %v425_v17, %v205_v26  ;;  %v250_v28 = vsel %vm234_vm2, %v196_v21, %v242_v24 }
 0x140   :  { %v245_v29 = vmul.f32 0.2, %v211_v25  ;;  %489 = vmatprep.mubr.msk.f32.mxu1 %vm267_vm3, %v250_v28  ;;  %vm237_vm4 = vcmp.gt.f32.partialorder %v211_v25, 0.0 }
 0x141   :  { %vm236_vm5 = vcmp.gt.f32.partialorder %v206_v27, 0.0  ;;  %v244_v31 = vmul.f32 0.2, %v206_v27  ;;  %v481_v32 = vpop.f32.mrb[4].mxu0  ;;  %490 = vmatmul.mubr.msk.f32.vlgmr.msra.gmra.mrb[0].mxu1 %vm267_vm3, %v251_v30 }
 0x142   :  { %v221_v33 = vadd.f32 %v481_v32, %v425_v17  ;;  %v215_v34 = vpop.f32.mrb[5].mxu0  ;;  %v253_v38 = vsel %vm237_vm4, %v211_v25, %v245_v29 }
 0x143   :  { %v216_v35 = vadd.f32 %v425_v17, %v215_v34  ;;  %v252_v36 = vsel %vm236_vm5, %v206_v27, %v244_v31 }
 0x144   :  { %v247_v37 = vmul.f32 0.2, %v221_v33  ;;  %492 = vmatprep.mubr.msk.f32.mxu1 %vm267_vm3, %v252_v36  ;;  %vm239_vm6 = vcmp.gt.f32.partialorder %v221_v33, 0.0 }
 0x145   :  { %vm238_vm7 = vcmp.gt.f32.partialorder %v216_v35, 0.0  ;;  %v246_v39 = vmul.f32 0.2, %v216_v35  ;;  %v484_v40 = vpop.f32.mrb[6].mxu0  ;;  %493 = vmatmul.mubr.msk.f32.gmra.mrb[2].mxu1 %vm267_vm3, %v253_v38 }
 0x146   :  { %v231_v41 = vadd.f32 %v484_v40, %v425_v17  ;;  %v225_v42 = vpop.f32.mrb[7].mxu0  ;;  %v255_v46 = vsel %vm239_vm6, %v221_v33, %v247_v37 }
 0x147   :  { %v226_v43 = vadd.f32 %v425_v17, %v225_v42  ;;  %v254_v44 = vsel %vm238_vm7, %v216_v35, %v246_v39 }
 0x148   :  { %v249_v45 = vmul.f32 0.2, %v231_v41  ;;  %495 = vmatprep.mubr.msk.f32.mxu1 %vm267_vm3, %v254_v44  ;;  %vm241_vm8 = vcmp.gt.f32.partialorder %v231_v41, 0.0 }
 0x149   :  { %vm240_vm9 = vcmp.gt.f32.partialorder %v226_v43, 0.0  ;;  %v248_v47 = vmul.f32 0.2, %v226_v43  ;;  %496 = vmatmul.mubr.msk.f32.gmra.mrb[4].mxu1 %vm267_vm3, %v255_v46 }
 0x14a   :  { %v257_v49 = vsel %vm241_vm8, %v231_v41, %v249_v45 }
 0x14b   :  { %v256_v48 = vsel %vm240_vm9, %v226_v43, %v248_v47 }
 0x14c   :  { %498 = vmatprep.mubr.msk.f32.mxu1 %vm267_vm3, %v256_v48 }
 0x14d   :  { %499 = vmatmul.mubr.msk.f32.gmra.mrb[6].mxu1 %vm267_vm3, %v257_v49 }
 0x214   :  { %v491_v51 = vpop.f32.mrb[0].mxu1 }
 0x215   :  { %v364_v52 = vadd.f32 %v491_v51, %v434_v50  ;;  %v358_v53 = vpop.f32.mrb[1].mxu1 }
 0x216   :  { %v359_v54 = vadd.f32 %v434_v50, %v358_v53 }
 0x217   :  { %399 = vst.msk [vmem:[#allocation11 + $0x8] sm:$0xff] %vm397_vm10, %v364_v52 }
 0x218   :  { %398 = vst.msk [vmem:[#allocation11] sm:$0xff] %vm397_vm10, %v359_v54  ;;  %v494_v55 = vpop.f32.mrb[2].mxu1 }
 0x219   :  { %v374_v56 = vadd.f32 %v494_v55, %v434_v50  ;;  %v368_v57 = vpop.f32.mrb[3].mxu1 }
 0x21a   :  { %v369_v58 = vadd.f32 %v434_v50, %v368_v57 }
 0x21b   :  { %401 = vst.msk [vmem:[#allocation11 + $0x18] sm:$0xff] %vm397_vm10, %v374_v56 }
 0x21c   :  { %400 = vst.msk [vmem:[#allocation11 + $0x10] sm:$0xff] %vm397_vm10, %v369_v58  ;;  %v497_v59 = vpop.f32.mrb[4].mxu1 }
 0x21d   :  { %v384_v60 = vadd.f32 %v497_v59, %v434_v50  ;;  %v378_v61 = vpop.f32.mrb[5].mxu1 }
 0x21e   :  { %v379_v62 = vadd.f32 %v434_v50, %v378_v61 }
 0x21f   :  { %403 = vst.msk [vmem:[#allocation11 + $0x28] sm:$0xff] %vm397_vm10, %v384_v60 }
 0x220   :  { %402 = vst.msk [vmem:[#allocation11 + $0x20] sm:$0xff] %vm397_vm10, %v379_v62  ;;  %v500_v63 = vpop.f32.mrb[6].mxu1 }
 0x221   :  { %v394_v0 = vadd.f32 %v500_v63, %v434_v50  ;;  %v388_v1 = vpop.f32.mrb[7].mxu1 }
 0x222   :  { %v389_v2 = vadd.f32 %v434_v50, %v388_v1 }
 0x223   :  { %405 = vst.msk [vmem:[#allocation11 + $0x38] sm:$0xff] %vm397_vm10, %v394_v0 }
 0x224   :  { %404 = vst.msk [vmem:[#allocation11 + $0x30] sm:$0xff] %vm397_vm10, %v389_v2 }
 0x225   :  { %642 = shalt.err (!%p639_p2)
}
 0x226   :  { %s643_s9 = scalar_lea.hbm %s819_s5, 1024 }
 0x227   :  { %p644_p3 = scmp.ne.s32.totalorder %s819_s5, %s643_s9  ;;  %p647_p4 = scmp.lt.u32.totalorder %s643_s9, %s819_s5 }
 0x229   :  { %p649_p5 = pnand %p647_p4, %p644_p3 }
 0x22b   :  { %652 = shalt.err (!%p649_p5)
}
 0x22c   :  { %417 = dma.vmem_to_hbm [thread:$0]  %s412_s3, 1024, %s819_s5, [#allocation4], %s663_s30, %s663_s30, %s664_s6  }
 0x22d   :  { %659 = dma.done.wait [#allocation4], 1024  }
 0x22e   :  { %660 = vsyncadd [#allocation4], 4294966272 }
 0x22f   :  { %421 = vsyncpa [#allocation3], 1 }
 0x230   :  { %422 = vsyncpa [#allocation6], 1 }
 0x231   :  { %423 = vsyncpa [#allocation9], 1 }
 0x232   :  { %424 = vsyncpa [#allocation4], 1 }

</bundles_post_ra>
